<compile_context>
chip_gen: v5e
topology: v5e:2x2
jax: 0.10.0
libtpu: 0.0.40
codegen_flags: <defaults>
</compile_context>

<pallas_src>
import functools

import jax
import jax.numpy as jnp
from jax.experimental import pallas as pl
from jax.experimental.pallas import tpu as pltpu


def _round_up(x, m):
    return (x + m - 1) // m * m


def naf_policy_kernel(sa_ref, w_ref, c_ref, out_ref, *, O, P):
    # ---- unpack inputs (all slices start on 128-lane boundaries) ----
    s = sa_ref[:, 0:P]           # zero-padded state      (tb, P)
    u = sa_ref[:, P:P + O]       # action                 (tb, O)

    w1 = w_ref[:, 0:P]           # (P, P)  rows >= input_size are zero
    w2 = w_ref[:, P:2 * P]       # (P, P)  rows >= hidden are zero
    wh = w_ref[:, 2 * P:3 * P]   # (P, P)  fused [Wv | Wmu | Wl | 0]

    b1 = c_ref[:, 0:P]           # (1, P)
    b2 = c_ref[:, P:2 * P]
    bh = c_ref[:, 2 * P:3 * P]   # fused [bv | bmu | bl | 0]
    tril = c_ref[:, 3 * P:3 * P + O * O]
    diag = c_ref[:, 4 * P:4 * P + O * O]

    # ---- trunk: x = tanh(W2 @ tanh(W1 @ s + b1) + b2) ----
    x = jnp.tanh(jnp.dot(s, w1, preferred_element_type=jnp.float32) + b1)
    x = jnp.tanh(jnp.dot(x, w2, preferred_element_type=jnp.float32) + b2)

    # ---- fused heads: one matmul produces [V | mu_pre | L_pre | 0] ----
    heads = jnp.dot(x, wh, preferred_element_type=jnp.float32) + bh   # (tb, P)

    V = heads[:, 0:1]                                   # (tb, 1)
    mu = jnp.tanh(heads[:, 1:1 + O])                    # (tb, O)
    Lflat = heads[:, 1 + O:1 + O + O * O]               # (tb, O*O)

    # L = L * tril_mask + exp(L) * diag_mask  (exp restricted to the diagonal
    # for robustness; identical result when no overflow occurs).
    Lm = Lflat * tril + jnp.exp(Lflat * diag) * diag

    u_mu = u - mu                                       # (tb, O)

    # y[b, k] = sum_i u_mu[b, i] * L[b, i, k]  ==  (L^T (u - mu))[b, k]
    y = jnp.zeros_like(u_mu)
    for i in range(O):                                  # O is tiny -> static unroll
        y = y + u_mu[:, i:i + 1] * Lm[:, i * O:(i + 1) * O]

    # A = -0.5 * (u-mu)^T L L^T (u-mu) = -0.5 * ||L^T (u-mu)||^2
    A = -0.5 * jnp.sum(y * y, axis=-1, keepdims=True)   # (tb, 1)

    # ---- single packed output slab: [mu | Q | V] ----
    out_ref[:, 0:O] = mu
    out_ref[:, O:O + 1] = A + V
    out_ref[:, O + 1:O + 2] = V


def naf_policy_forward(state, action, params, *, tile_b=None):
    (w1, b1, w2, b2, wv, bv, wmu, bmu, wl, bl, tril_flat, diag_flat) = params
    B, input_size = state.shape
    O = action.shape[1]
    hidden = w1.shape[1]
    head_f = 1 + O + O * O
    P = _round_up(max(input_size, hidden, head_f, 1), 128)
    assert input_size <= P and hidden <= P and head_f <= P

    # ---- pack weights into one (P, 3P) array of 128-aligned column blocks ----
    W = jnp.zeros((P, 3 * P), jnp.float32)
    W = W.at[:input_size, 0:hidden].set(w1)
    W = W.at[:hidden, P:P + hidden].set(w2)
    W = W.at[:hidden, 2 * P:2 * P + 1].set(wv)
    W = W.at[:hidden, 2 * P + 1:2 * P + 1 + O].set(wmu)
    W = W.at[:hidden, 2 * P + 1 + O:2 * P + head_f].set(wl)

    # ---- pack biases + masks into one (1, 5P) constants row ----
    C = jnp.zeros((1, 5 * P), jnp.float32)
    C = C.at[:, 0:hidden].set(b1)
    C = C.at[:, P:P + hidden].set(b2)
    C = C.at[:, 2 * P:2 * P + 1].set(bv)
    C = C.at[:, 2 * P + 1:2 * P + 1 + O].set(bmu)
    C = C.at[:, 2 * P + 1 + O:2 * P + head_f].set(bl)
    C = C.at[:, 3 * P:3 * P + O * O].set(tril_flat)
    C = C.at[:, 4 * P:4 * P + O * O].set(diag_flat)

    # ---- pack [state | zero-pad | action] -> (B, P + O) ----
    SA = jnp.zeros((B, P + O), jnp.float32)
    SA = SA.at[:, :input_size].set(state)
    SA = SA.at[:, P:P + O].set(action)

    if tile_b is None:
        tile_b = B if B <= 512 else 256
    assert B % tile_b == 0, "batch must be divisible by tile_b"
    grid = (B // tile_b,)

    kernel = functools.partial(naf_policy_kernel, O=O, P=P)

    out = pl.pallas_call(
        kernel,
        grid=grid,
        in_specs=[
            pl.BlockSpec((tile_b, P + O), lambda i: (i, 0)),   # SA (batch-tiled)
            pl.BlockSpec((P, 3 * P), lambda i: (0, 0)),        # packed weights
            pl.BlockSpec((1, 5 * P), lambda i: (0, 0)),        # packed consts
        ],
        out_specs=pl.BlockSpec((tile_b, O + 2), lambda i: (i, 0)),
        out_shape=jax.ShapeDtypeStruct((B, O + 2), jnp.float32),
        compiler_params=pltpu.CompilerParams(
            dimension_semantics=("parallel",)),
    )(SA, W, C)

    mu = out[:, 0:O]
    Q = out[:, O:O + 1]
    V = out[:, O + 1:O + 2]
    return mu, Q, V


def init_params(key, input_size, hidden_size, output_size):
    """Deterministic xavier-uniform init (mirrors `self.apply(xavier_init)`)."""
    def linear(key, fan_in, fan_out):
        limit = (6.0 / (fan_in + fan_out)) ** 0.5
        w = jax.random.uniform(key, (fan_in, fan_out), jnp.float32, -limit, limit)
        b = jnp.zeros((1, fan_out), jnp.float32)
        return w, b

    k1, k2, kv, kmu, kl = jax.random.split(key, 5)
    w1, b1 = linear(k1, input_size, hidden_size)
    w2, b2 = linear(k2, hidden_size, hidden_size)
    wv, bv = linear(kv, hidden_size, 1)
    wmu, bmu = linear(kmu, hidden_size, output_size)
    wl, bl = linear(kl, hidden_size, output_size * output_size)

    O = output_size
    tril_flat = jnp.tril(jnp.ones((O, O), jnp.float32), k=-1).reshape(1, O * O)
    diag_flat = jnp.eye(O, dtype=jnp.float32).reshape(1, O * O)
    return (w1, b1, w2, b2, wv, bv, wmu, bmu, wl, bl, tril_flat, diag_flat)


def reference_forward(state, action, params):
    """Plain-JAX reference matching the PyTorch forward (for verification)."""
    (w1, b1, w2, b2, wv, bv, wmu, bmu, wl, bl, tril_flat, diag_flat) = params
    O = action.shape[1]
    x = jnp.tanh(state @ w1 + b1)
    x = jnp.tanh(x @ w2 + b2)
    V = x @ wv + bv
    mu = jnp.tanh(x @ wmu + bmu)
    Lf = x @ wl + bl
    L = Lf.reshape(-1, O, O)
    tril = tril_flat.reshape(1, O, O)
    diag = diag_flat.reshape(1, O, O)
    L = L * tril + jnp.exp(L) * diag
    P = jnp.einsum('bij,bkj->bik', L, L)
    u_mu = action - mu
    A = -0.5 * jnp.einsum('bi,bij,bj->b', u_mu, P, u_mu)[:, None]
    Q = A + V
    return mu, Q, V


if __name__ == "__main__":
    INPUT_SIZE, HIDDEN_SIZE, OUTPUT_SIZE, BATCH = 8, 32, 4, 8

    key = jax.random.PRNGKey(0)
    k_state, k_action, k_params = jax.random.split(key, 3)

    state = jax.random.normal(k_state, (BATCH, INPUT_SIZE), jnp.float32)
    action = jax.random.uniform(k_action, (BATCH, OUTPUT_SIZE), jnp.float32,
                                -1.0, 1.0)
    params = init_params(k_params, INPUT_SIZE, HIDDEN_SIZE, OUTPUT_SIZE)

    mu, Q, V = jax.block_until_ready(naf_policy_forward(state, action, params))

    mu_ref, Q_ref, V_ref = reference_forward(state, action, params)
    assert mu.shape == (BATCH, OUTPUT_SIZE) and Q.shape == (BATCH, 1) and V.shape == (BATCH, 1)
    assert jnp.allclose(mu, mu_ref, atol=1e-4, rtol=1e-4)
    assert jnp.allclose(V, V_ref, atol=1e-4, rtol=1e-4)
    assert jnp.allclose(Q, Q_ref, atol=1e-4, rtol=1e-4)

    print("KERNEL_OK")
</pallas_src>

<mosaic_0001>
module attributes {stable_mosaic.version = 11 : i64} {
  func.func @naf_policy_kernel(%arg0: i32, %arg1: memref<8x132xf32, #tpu.memory_space<vmem>>, %arg2: memref<128x384xf32, #tpu.memory_space<vmem>>, %arg3: memref<1x640xf32, #tpu.memory_space<vmem>>, %arg4: memref<8x6xf32, #tpu.memory_space<vmem>>) attributes {dimension_semantics = [#tpu.dimension_semantics<parallel>], iteration_bounds = array<i64: 1>, scalar_prefetch = 0 : i64, scratch_operands = 0 : i64, tpu.core_type = #tpu.core_type<tc>, window_params = [{transform_indices = @transform_0, window_bounds = array<i64: 8, 132>}, {pipeline_mode = #tpu.pipeline_mode<synchronous>, transform_indices = @transform_1, window_bounds = array<i64: 128, 384>}, {pipeline_mode = #tpu.pipeline_mode<synchronous>, transform_indices = @transform_2, window_bounds = array<i64: 1, 640>}, {transform_indices = @transform_3, window_bounds = array<i64: 8, 6>}]} {
    %c0 = arith.constant 0 : index
    %c0_0 = arith.constant 0 : index
    %0 = vector.load %arg1[%c0, %c0_0] : memref<8x132xf32, #tpu.memory_space<vmem>>, vector<8x128xf32>
    %c0_1 = arith.constant 0 : index
    %c128 = arith.constant 128 : index
    %1 = vector.load %arg1[%c0_1, %c128] : memref<8x132xf32, #tpu.memory_space<vmem>>, vector<8x4xf32>
    %c0_2 = arith.constant 0 : index
    %c0_3 = arith.constant 0 : index
    %2 = vector.load %arg2[%c0_2, %c0_3] : memref<128x384xf32, #tpu.memory_space<vmem>>, vector<128x128xf32>
    %c0_4 = arith.constant 0 : index
    %c128_5 = arith.constant 128 : index
    %3 = vector.load %arg2[%c0_4, %c128_5] : memref<128x384xf32, #tpu.memory_space<vmem>>, vector<128x128xf32>
    %c0_6 = arith.constant 0 : index
    %c256 = arith.constant 256 : index
    %4 = vector.load %arg2[%c0_6, %c256] : memref<128x384xf32, #tpu.memory_space<vmem>>, vector<128x128xf32>
    %c0_7 = arith.constant 0 : index
    %c0_8 = arith.constant 0 : index
    %5 = vector.load %arg3[%c0_7, %c0_8] : memref<1x640xf32, #tpu.memory_space<vmem>>, vector<1x128xf32>
    %c0_9 = arith.constant 0 : index
    %c128_10 = arith.constant 128 : index
    %6 = vector.load %arg3[%c0_9, %c128_10] : memref<1x640xf32, #tpu.memory_space<vmem>>, vector<1x128xf32>
    %c0_11 = arith.constant 0 : index
    %c256_12 = arith.constant 256 : index
    %7 = vector.load %arg3[%c0_11, %c256_12] : memref<1x640xf32, #tpu.memory_space<vmem>>, vector<1x128xf32>
    %c0_13 = arith.constant 0 : index
    %c384 = arith.constant 384 : index
    %8 = vector.load %arg3[%c0_13, %c384] : memref<1x640xf32, #tpu.memory_space<vmem>>, vector<1x16xf32>
    %c0_14 = arith.constant 0 : index
    %c512 = arith.constant 512 : index
    %9 = vector.load %arg3[%c0_14, %c512] : memref<1x640xf32, #tpu.memory_space<vmem>>, vector<1x16xf32>
    %cst = arith.constant dense<0.000000e+00> : vector<8x128xf32>
    %10 = tpu.matmul %0, %2, %cst {dimension_numbers = #tpu.dot_dimension_numbers<[1], [0], [0], [1], [0, 0, 1, 1], [], []>} : vector<8x128xf32>, vector<128x128xf32>, vector<8x128xf32> -> vector<8x128xf32>
    %11 = vector.broadcast %5 : vector<1x128xf32> to vector<8x128xf32>
    %12 = arith.addf %10, %11 : vector<8x128xf32>
    %13 = math.tanh %12 : vector<8x128xf32>
    %cst_15 = arith.constant dense<0.000000e+00> : vector<8x128xf32>
    %14 = tpu.matmul %13, %3, %cst_15 {dimension_numbers = #tpu.dot_dimension_numbers<[1], [0], [0], [1], [0, 0, 1, 1], [], []>} : vector<8x128xf32>, vector<128x128xf32>, vector<8x128xf32> -> vector<8x128xf32>
    %15 = vector.broadcast %6 : vector<1x128xf32> to vector<8x128xf32>
    %16 = arith.addf %14, %15 : vector<8x128xf32>
    %17 = math.tanh %16 : vector<8x128xf32>
    %cst_16 = arith.constant dense<0.000000e+00> : vector<8x128xf32>
    %18 = tpu.matmul %17, %4, %cst_16 {dimension_numbers = #tpu.dot_dimension_numbers<[1], [0], [0], [1], [0, 0, 1, 1], [], []>} : vector<8x128xf32>, vector<128x128xf32>, vector<8x128xf32> -> vector<8x128xf32>
    %19 = vector.broadcast %7 : vector<1x128xf32> to vector<8x128xf32>
    %20 = arith.addf %18, %19 : vector<8x128xf32>
    %21 = vector.extract_strided_slice %20 {offsets = [0, 0], sizes = [8, 1], strides = [1, 1]} : vector<8x128xf32> to vector<8x1xf32>
    %22 = vector.extract_strided_slice %20 {offsets = [0, 1], sizes = [8, 4], strides = [1, 1]} : vector<8x128xf32> to vector<8x4xf32>
    %23 = math.tanh %22 : vector<8x4xf32>
    %24 = vector.extract_strided_slice %20 {offsets = [0, 5], sizes = [8, 16], strides = [1, 1]} : vector<8x128xf32> to vector<8x16xf32>
    %25 = vector.broadcast %8 : vector<1x16xf32> to vector<8x16xf32>
    %26 = arith.mulf %24, %25 : vector<8x16xf32>
    %27 = vector.broadcast %9 : vector<1x16xf32> to vector<8x16xf32>
    %28 = arith.mulf %24, %27 : vector<8x16xf32>
    %29 = math.exp %28 : vector<8x16xf32>
    %30 = vector.broadcast %9 : vector<1x16xf32> to vector<8x16xf32>
    %31 = arith.mulf %29, %30 : vector<8x16xf32>
    %32 = arith.addf %26, %31 : vector<8x16xf32>
    %33 = arith.subf %1, %23 : vector<8x4xf32>
    %cst_17 = arith.constant 0.000000e+00 : f32
    %34 = vector.broadcast %cst_17 : f32 to vector<8x4xf32>
    %35 = vector.extract_strided_slice %33 {offsets = [0, 0], sizes = [8, 1], strides = [1, 1]} : vector<8x4xf32> to vector<8x1xf32>
    %36 = vector.extract_strided_slice %32 {offsets = [0, 0], sizes = [8, 4], strides = [1, 1]} : vector<8x16xf32> to vector<8x4xf32>
    %37 = vector.broadcast %35 : vector<8x1xf32> to vector<8x4xf32>
    %38 = arith.mulf %37, %36 : vector<8x4xf32>
    %39 = arith.addf %34, %38 : vector<8x4xf32>
    %40 = vector.extract_strided_slice %33 {offsets = [0, 1], sizes = [8, 1], strides = [1, 1]} : vector<8x4xf32> to vector<8x1xf32>
    %41 = vector.extract_strided_slice %32 {offsets = [0, 4], sizes = [8, 4], strides = [1, 1]} : vector<8x16xf32> to vector<8x4xf32>
    %42 = vector.broadcast %40 : vector<8x1xf32> to vector<8x4xf32>
    %43 = arith.mulf %42, %41 : vector<8x4xf32>
    %44 = arith.addf %39, %43 : vector<8x4xf32>
    %45 = vector.extract_strided_slice %33 {offsets = [0, 2], sizes = [8, 1], strides = [1, 1]} : vector<8x4xf32> to vector<8x1xf32>
    %46 = vector.extract_strided_slice %32 {offsets = [0, 8], sizes = [8, 4], strides = [1, 1]} : vector<8x16xf32> to vector<8x4xf32>
    %47 = vector.broadcast %45 : vector<8x1xf32> to vector<8x4xf32>
    %48 = arith.mulf %47, %46 : vector<8x4xf32>
    %49 = arith.addf %44, %48 : vector<8x4xf32>
    %50 = vector.extract_strided_slice %33 {offsets = [0, 3], sizes = [8, 1], strides = [1, 1]} : vector<8x4xf32> to vector<8x1xf32>
    %51 = vector.extract_strided_slice %32 {offsets = [0, 12], sizes = [8, 4], strides = [1, 1]} : vector<8x16xf32> to vector<8x4xf32>
    %52 = vector.broadcast %50 : vector<8x1xf32> to vector<8x4xf32>
    %53 = arith.mulf %52, %51 : vector<8x4xf32>
    %54 = arith.addf %49, %53 : vector<8x4xf32>
    %55 = arith.mulf %54, %54 : vector<8x4xf32>
    %cst_18 = arith.constant dense<0.000000e+00> : vector<8xf32>
    %56 = vector.multi_reduction <add>, %55, %cst_18 [1] : vector<8x4xf32> to vector<8xf32>
    %57 = vector.shape_cast %56 : vector<8xf32> to vector<8x1xf32>
    %cst_19 = arith.constant -5.000000e-01 : f32
    %58 = vector.broadcast %cst_19 : f32 to vector<8x1xf32>
    %59 = arith.mulf %58, %57 : vector<8x1xf32>
    %c0_20 = arith.constant 0 : index
    %c0_21 = arith.constant 0 : index
    %60 = vector.load %arg4[%c0_20, %c0_21] : memref<8x6xf32, #tpu.memory_space<vmem>>, vector<8x4xf32>
    tpu.vector_store %arg4[%c0_20, %c0_21], %23 {strides = array<i32>} : memref<8x6xf32, #tpu.memory_space<vmem>>, vector<8x4xf32>,
    %61 = arith.addf %59, %21 : vector<8x1xf32>
    %c0_22 = arith.constant 0 : index
    %c4 = arith.constant 4 : index
    %62 = vector.load %arg4[%c0_22, %c4] : memref<8x6xf32, #tpu.memory_space<vmem>>, vector<8x1xf32>
    tpu.vector_store %arg4[%c0_22, %c4], %61 {strides = array<i32>} : memref<8x6xf32, #tpu.memory_space<vmem>>, vector<8x1xf32>,
    %c0_23 = arith.constant 0 : index
    %c5 = arith.constant 5 : index
    %63 = vector.load %arg4[%c0_23, %c5] : memref<8x6xf32, #tpu.memory_space<vmem>>, vector<8x1xf32>
    tpu.vector_store %arg4[%c0_23, %c5], %21 {strides = array<i32>} : memref<8x6xf32, #tpu.memory_space<vmem>>, vector<8x1xf32>,
    return
  }
  func.func @transform_0(%arg0: i32) -> (i32, i32) {
    %c0_i32 = arith.constant 0 : i32
    %c0_i32_0 = arith.constant 0 : i32
    return %arg0, %c0_i32 : i32, i32
  }
  func.func @transform_1(%arg0: i32) -> (i32, i32) {
    %c0_i32 = arith.constant 0 : i32
    %c0_i32_0 = arith.constant 0 : i32
    %c0_i32_1 = arith.constant 0 : i32
    return %c0_i32, %c0_i32_0 : i32, i32
  }
  func.func @transform_2(%arg0: i32) -> (i32, i32) {
    %c0_i32 = arith.constant 0 : i32
    %c0_i32_0 = arith.constant 0 : i32
    %c0_i32_1 = arith.constant 0 : i32
    return %c0_i32, %c0_i32_0 : i32, i32
  }
  func.func @transform_3(%arg0: i32) -> (i32, i32) {
    %c0_i32 = arith.constant 0 : i32
    %c0_i32_0 = arith.constant 0 : i32
    return %arg0, %c0_i32 : i32, i32
  }
}

</mosaic_0001>

<bundles_post_ra>
// kernel: tpu_custom_call.1
= control target key start
LH: loop header
LB: loop body
LE: loop exit
PB: predicated region body
PF: predicated region fallthrough
CT: control target
= control target key end

     0   :  { %8 = vsyncpa [#allocation3], 0  ;;  %s483_s0 = inlined_call_operand.hbm [shape: f32[8,132], index: 0, kind: input, shape index: {}]   ;;  %s484_s1 = inlined_call_operand.hbm [shape: f32[128,384], index: 1, kind: input, shape index: {}]   ;;  %s485_s2 = inlined_call_operand.hbm [shape: f32[1,640], index: 2, kind: input, shape index: {}]   ;;  %s486_s3 = inlined_call_operand.hbm [shape: f32[8,6], index: 3, kind: output, shape index: {}]  }
   0x1   :  { %9 = vsyncpa [#allocation6], 0  ;;  %s26_s14 = sshll.u32 %s484_s1, 4  ;;  %s27_s14 = int_to_ptr.hbm [resolvable:$true] %s26_s14 }
   0x2   :  { %10 = vsyncpa [#allocation4], 0  ;;  %s422_s15 = smov [#allocation5]   ;;  %s16_s19 = sshll.u32 %s483_s0, 4  ;;  %s17_s19 = int_to_ptr.hbm [resolvable:$true] %s16_s19 }
   0x3   :  { %s28_s16 = sshll.u32 %s422_s15, 4  ;;  %s423_s20 = smov 384   ;;  %s29_s16 = int_to_ptr.vmem [resolvable:$true] %s28_s16 }
   0x4   :  { %s424_s21 = smov 24   ;;  %s425_s22 = smov [#allocation2]  }
   0x5   :  { %34 = dma.hbm_to_vmem [thread:$0]  %s27_s14, 6144, %s29_s16, [#allocation6], %s423_s20, %s423_s20, %s424_s21  }
   0x6   :  { %s18_s23 = sshll.u32 %s425_s22, 4  ;;  %s40_s26 = sshll.u32 %s485_s2, 4  ;;  %s19_s23 = int_to_ptr.vmem [resolvable:$true] %s18_s23  ;;  %s41_s26 = int_to_ptr.hbm [resolvable:$true] %s40_s26 }
   0x7   :  { %21 = dma.hbm_to_vmem [thread:$0]  %s17_s19, 256, %s19_s23, [#allocation3]  }
   0x8   :  { %s426_s1 = smov [#allocation7]  }
   0x9   :  { %s42_s27 = sshll.u32 %s426_s1, 4  ;;  %s43_s27 = int_to_ptr.vmem [resolvable:$true] %s42_s27 }
   0xa   :  { %45 = dma.hbm_to_vmem [thread:$0]  %s41_s26, 80, %s43_s27, [#allocation6]  }
   0xb   :  { %416 = dma.done.wait [#allocation3], 256  }
   0xc   :  { %417 = vsyncadd [#allocation3], 4294967040 }
   0xd   :  { %418 = dma.done.wait [#allocation6], 6224  }
   0xe   :  { %419 = vsyncadd [#allocation6], 4294961072  ;;  %v75_v0 = vld [vmem:[#allocation5 + $0x168] sm:$0xff]  ;;  %v74_v1 = vld [vmem:[#allocation5 + $0x150] sm:$0xff]  ;;  %s427_s0 = smov 5   ;;  %s428_s2 = smov 127  }
   0xf   :  { %116 = vmatpush.msra.mxu0 %v75_v0  ;;  %v73_v2 = vld [vmem:[#allocation5 + $0x138] sm:$0xff]  ;;  %v72_v3 = vld [vmem:[#allocation5 + $0x120] sm:$0xff]  ;;  %v91_v4 = vld [vmem:[#allocation5 + $0x170] sm:$0xff]  ;;  %v429_v63 = vmov 2   ;;  %v430_v0 = vmov 1   ;;  %vm248_vm0 = vcmask 31744  }
  0x10   :  { %v71_v5 = vld [vmem:[#allocation5 + $0x108] sm:$0xff]  ;;  %140 = vmatpush.msra.mxu1 %v91_v4  ;;  %v90_v6 = vld [vmem:[#allocation5 + $0x158] sm:$0xff]  ;;  %v89_v7 = vld [vmem:[#allocation5 + $0x140] sm:$0xff]  ;;  %303 = vset.pattern.permute.xlu2 %v429_v63  ;;  %s433_s28 = smov 120   ;;  %s434_s29 = smov 124   ;;  %vm259_vm1 = vcmask 39968  }
  0x11   :  { %117 = vmatpush.msra.mxu0 %v74_v1  ;;  %v70_v8 = vld [vmem:[#allocation5 + $0xf0] sm:$0xff]  ;;  %v69_v9 = vld [vmem:[#allocation5 + $0xd8] sm:$0xff]  ;;  %v88_v10 = vld [vmem:[#allocation5 + $0x128] sm:$0xff]  ;;  %302 = vset.pattern.permute.xlu1 %v430_v0  ;;  %v431_v1 = vmov 0   ;;  %s435_s30 = smov 116   ;;  %s436_s4 = smov 123  }
  0x12   :  { %141 = vmatpush.msra.mxu1 %v90_v6  ;;  %v87_v11 = vld [vmem:[#allocation5 + $0x110] sm:$0xff]  ;;  %v68_v12 = vld [vmem:[#allocation5 + $0xc0] sm:$0xff]  ;;  %v86_v13 = vld [vmem:[#allocation5 + $0xf8] sm:$0xff]  ;;  %305 = vset.pattern.permute.xlu0 %v431_v1  ;;  %s437_s5 = smov 4   ;;  %s438_s6 = smov [#allocation8]   ;;  %vm265_vm2 = vcmask 48168  }
  0x13   :  { %118 = vmatpush.msra.mxu0 %v73_v2  ;;  %v67_v14 = vld [vmem:[#allocation5 + $0xa8] sm:$0xff]  ;;  %v85_v15 = vld [vmem:[#allocation5 + $0xe0] sm:$0xff]  ;;  %v66_v16 = vld [vmem:[#allocation5 + $0x90] sm:$0xff]  ;;  %s272_s7 = sshll.u32 %s438_s6, 4  ;;  %s274_s10 = sshll.u32 %s486_s3, 4  ;;  %s273_s7 = int_to_ptr.vmem [resolvable:$true] %s272_s7  ;;  %s275_s10 = int_to_ptr.hbm [resolvable:$true] %s274_s10 }
  0x14   :  { %142 = vmatpush.msra.mxu1 %v89_v7  ;;  %v84_v17 = vld [vmem:[#allocation5 + $0xc8] sm:$0xff]  ;;  %v65_v18 = vld [vmem:[#allocation5 + $0x78] sm:$0xff]  ;;  %v83_v19 = vld [vmem:[#allocation5 + $0xb0] sm:$0xff] }
  0x15   :  { %119 = vmatpush.msra.mxu0 %v72_v3  ;;  %v64_v20 = vld [vmem:[#allocation5 + $0x60] sm:$0xff]  ;;  %v82_v21 = vld [vmem:[#allocation5 + $0x98] sm:$0xff]  ;;  %v63_v22 = vld [vmem:[#allocation5 + $0x48] sm:$0xff] }
  0x16   :  { %143 = vmatpush.msra.mxu1 %v88_v10  ;;  %v81_v23 = vld [vmem:[#allocation5 + $0x80] sm:$0xff]  ;;  %v62_v24 = vld [vmem:[#allocation5 + $0x30] sm:$0xff]  ;;  %v61_v25 = vld [vmem:[#allocation5 + $0x18] sm:$0xff] }
  0x17   :  { %120 = vmatpush.msra.mxu0 %v71_v5  ;;  %v60_v26 = vld [vmem:[#allocation5] sm:$0xff]  ;;  %v58_v27 = vld [vmem:[#allocation2] sm:$0xff]  ;;  %v80_v28 = vld [vmem:[#allocation5 + $0x68] sm:$0xff]  ;;  %v432_v5 = vmov 3  }
  0x18   :  { %144 = vmatpush.msra.mxu1 %v87_v11  ;;  %v79_v29 = vld [vmem:[#allocation5 + $0x50] sm:$0xff]  ;;  %v78_v30 = vld [vmem:[#allocation5 + $0x38] sm:$0xff]  ;;  %v77_v31 = vld [vmem:[#allocation5 + $0x20] sm:$0xff] }
  0x19   :  { %121 = vmatpush.msra.mxu0 %v70_v8  ;;  %v76_v32 = vld [vmem:[#allocation5 + $0x8] sm:$0xff]  ;;  %v107_v33 = vld [vmem:[#allocation5 + $0x178] sm:$0xff]  ;;  %v106_v34 = vld [vmem:[#allocation5 + $0x160] sm:$0xff] }
  0x1a   :  { %145 = vmatpush.msra.mxu1 %v86_v13  ;;  %164 = vmatpush.msra.mxu2 %v107_v33  ;;  %v105_v35 = vld [vmem:[#allocation5 + $0x148] sm:$0xff]  ;;  %v104_v36 = vld [vmem:[#allocation5 + $0x130] sm:$0xff]  ;;  %v103_v37 = vld [vmem:[#allocation5 + $0x118] sm:$0xff] }
  0x1b   :  { %122 = vmatpush.msra.mxu0 %v69_v9  ;;  %v102_v38 = vld [vmem:[#allocation5 + $0x100] sm:$0xff]  ;;  %v101_v39 = vld [vmem:[#allocation5 + $0xe8] sm:$0xff]  ;;  %v100_v40 = vld [vmem:[#allocation5 + $0xd0] sm:$0xff] }
  0x1c   :  { %146 = vmatpush.msra.mxu1 %v85_v15  ;;  %165 = vmatpush.msra.mxu2 %v106_v34  ;;  %v99_v41 = vld [vmem:[#allocation5 + $0xb8] sm:$0xff]  ;;  %v98_v42 = vld [vmem:[#allocation5 + $0xa0] sm:$0xff]  ;;  %v97_v43 = vld [vmem:[#allocation5 + $0x88] sm:$0xff] }
  0x1d   :  { %123 = vmatpush.msra.mxu0 %v68_v12  ;;  %v307_v44 = vld [vmem:[#allocation7] ss:$0 sm:$0xff]  ;;  %v96_v48 = vld [vmem:[#allocation5 + $0x70] sm:$0xff]  ;;  %v95_v49 = vld [vmem:[#allocation5 + $0x58] sm:$0xff] }
  0x1e   :  { %147 = vmatpush.msra.mxu1 %v84_v17  ;;  %166 = vmatpush.msra.mxu2 %v105_v35  ;;  %v94_v50 = vld [vmem:[#allocation5 + $0x40] sm:$0xff]  ;;  %v93_v51 = vld [vmem:[#allocation5 + $0x28] sm:$0xff]  ;;  %v92_v52 = vld [vmem:[#allocation5 + $0x10] sm:$0xff] }
  0x1f   :  { %124 = vmatpush.msra.mxu0 %v67_v14  ;;  %v309_v53 = vld [vmem:[#allocation7 + $0x3] ss:$0 sm:$0xff]  ;;  %v308_v54 = vld [vmem:[#allocation7 + $0x1] ss:$0 sm:$0xff]  ;;  %v310_v58 = vld [vmem:[#allocation7 + $0x2] ss:$0 sm:$0xff] }
  0x20   :  { %148 = vmatpush.msra.mxu1 %v83_v19  ;;  %167 = vmatpush.msra.mxu2 %v104_v36  ;;  %v311_v62 = vld [vmem:[#allocation7 + $0x4] ss:$0 sm:$0xff]  ;;  %v59_v2 = vld [vmem:[#allocation2 + $0x8] sm:$0xff] }
  0x21   :  { %125 = vmatpush.msra.mxu0 %v66_v16  ;;  %187 = vrot.lane.b32.xlu1 %v309_v53, %s427_s0 }
  0x22   :  { %149 = vmatpush.msra.mxu1 %v82_v21  ;;  %168 = vmatpush.msra.mxu2 %v103_v37 }
  0x23   :  { %126 = vmatpush.msra.mxu0 %v65_v18 }
  0x24   :  { %150 = vmatpush.msra.mxu1 %v81_v23  ;;  %169 = vmatpush.msra.mxu2 %v102_v38 }
  0x25   :  { %127 = vmatpush.msra.mxu0 %v64_v20 }
  0x26   :  { %151 = vmatpush.msra.mxu1 %v80_v28  ;;  %170 = vmatpush.msra.mxu2 %v101_v39 }
  0x27   :  { %128 = vmatpush.msra.mxu0 %v63_v22 }
  0x28   :  { %152 = vmatpush.msra.mxu1 %v79_v29  ;;  %171 = vmatpush.msra.mxu2 %v100_v40 }
  0x29   :  { %129 = vmatpush.msra.mxu0 %v62_v24 }
  0x2a   :  { %153 = vmatpush.msra.mxu1 %v78_v30  ;;  %172 = vmatpush.msra.mxu2 %v99_v41 }
  0x2b   :  { %130 = vmatpush.msra.mxu0 %v61_v25 }
  0x2c   :  { %154 = vmatpush.msra.mxu1 %v77_v31  ;;  %173 = vmatpush.msra.mxu2 %v98_v42 }
  0x2d   :  { %131 = vmatpush.msra.mxu0 %v60_v26 }
  0x2e   :  { %132 = vmatmul.f32.vlgmr.msra.gmra.mxu0 %v58_v27  ;;  %155 = vmatpush.msra.mxu1 %v76_v32 }
  0x2f   :  { %174 = vmatpush.msra.mxu2 %v97_v43 }
  0x31   :  { %175 = vmatpush.msra.mxu2 %v96_v48 }
  0x33   :  { %176 = vmatpush.msra.mxu2 %v95_v49 }
  0x35   :  { %177 = vmatpush.msra.mxu2 %v94_v50 }
  0x37   :  { %178 = vmatpush.msra.mxu2 %v93_v51 }
  0x39   :  { %179 = vmatpush.msra.mxu2 %v92_v52 }
  0x93   :  { %v188_v10 = vpop.permute.xlu1 %187 }
  0xab   :  { %v133_v45 = vpop.f32.mrf.mxu0 }
  0xac   :  { %v134_v46 = vadd.f32 %v307_v44, %v133_v45 }
  0xae   :  { %312 = vtanh.f32 %v134_v46 }
  0xb4   :  { %v313_v47 = vpop.eup %312 }
  0xb5   :  { %156 = vmatmul.f32.vlgmr.msra.gmra.mxu1 %v313_v47 }
 0x132   :  { %v157_v55 = vpop.f32.mrf.mxu1 }
 0x133   :  { %v158_v56 = vadd.f32 %v308_v54, %v157_v55 }
 0x135   :  { %314 = vtanh.f32 %v158_v56 }
 0x13b   :  { %v315_v57 = vpop.eup %314 }
 0x13c   :  { %180 = vmatmul.f32.vlgmr.msra.gmra.mxu2 %v315_v57 }
 0x1bf   :  { %v181_v59 = vpop.f32.mrf.mxu2 }
 0x1c0   :  { %v469_v60 = vadd.f32 %v310_v58, %v181_v59 }
 0x1c2   :  { %316 = vtanh.f32 %v469_v60  ;;  %v190_v12 = vmul.f32 %v188_v10, %v469_v60 }
 0x1c8   :  { %v317_v61 = vpop.eup %316 }
 0x1c9   :  { %202 = vrot.lane.b32.xlu0 %v317_v61, %s428_s2 }
 0x1d1   :  { %193 = vrot.lane.b32.xlu0 %v311_v62, %s427_s0 }
 0x23b   :  { %v203_v3 = vpop.permute.xlu0 %202 }
 0x23c   :  { %v205_v4 = vsub.f32 %v59_v2, %v203_v3  ;;  %253 = vst.msk [vmem:[#allocation8] sm:$0xff] %vm248_vm0, %v203_v3 }
 0x23e   :  { %208 = vperm.xlu0 %305, %v205_v4   ;;  %224 = vperm.xlu2 %303, %v205_v4  }
 0x23f   :  { %214 = vperm.xlu1 %302, %v205_v4  }
 0x243   :  { %v194_v6 = vpop.permute.xlu0 %193 }
 0x244   :  { %v196_v7 = vmul.f32 %v194_v6, %v469_v60 }
 0x246   :  { %304 = vset.pattern.permute.xlu2 %v432_v5  ;;  %306 = vset.pattern.permute.xlu0 %v432_v5  ;;  %v197_v8 = vmul.f32 1.442695, %v196_v7 }
 0x247   :  { %234 = vperm.xlu2 %304, %v205_v4  }
 0x248   :  { %318 = vpow2.f32 %v197_v8 }
 0x24e   :  { %v319_v9 = vpop.eup %318 }
 0x24f   :  { %v199_v11 = vmul.f32 %v319_v9, %v194_v6 }
 0x251   :  { %v200_v13 = vadd.f32 %v199_v11, %v190_v12 }
 0x298   :  { %v225_v14 = vpop.permute.xlu2 %224 }
 0x299   :  { %v227_v15 = vmul.f32 %v225_v14, %v200_v13 }
 0x29b   :  { %229 = vrot.lane.b32.xlu2 %v227_v15, %s433_s28 }
 0x2a1   :  { %v235_v18 = vpop.permute.xlu2 %234 }
 0x2a2   :  { %v237_v19 = vmul.f32 %v235_v18, %v200_v13 }
 0x2b0   :  { %v209_v20 = vpop.permute.xlu0 %208 }
 0x2b1   :  { %v215_v16 = vpop.permute.xlu1 %214  ;;  %v211_v22 = vmul.f32 %v209_v20, %v200_v13 }
 0x2b2   :  { %v217_v17 = vmul.f32 %v215_v16, %v200_v13 }
 0x2b4   :  { %219 = vrot.lane.b32.xlu1 %v217_v17, %s434_s29 }
 0x2bc   :  { %239 = vrot.lane.b32.xlu1 %v237_v19, %s435_s30 }
 0x2f5   :  { %v230_v24 = vpop.permute.xlu2 %229 }
 0x326   :  { %v220_v21 = vpop.permute.xlu1 %219 }
 0x327   :  { %v222_v23 = vadd.f32 %v220_v21, %v211_v22 }
 0x329   :  { %v232_v25 = vadd.f32 %v230_v24, %v222_v23 }
 0x32e   :  { %v240_v26 = vpop.permute.xlu1 %239 }
 0x32f   :  { %v242_v27 = vadd.f32 %v240_v26, %v232_v25 }
 0x331   :  { %v243_v28 = vmul.f32 %v242_v27, %v242_v27 }
 0x333   :  { %245 = vrot.lane.b32.xlu2 %v243_v28, %s436_s4 }
 0x33b   :  { %262 = vrot.lane.b32.xlu2 %v469_v60, %s427_s0 }
 0x38d   :  { %v246_v29 = vpop.permute.xlu2 %245 }
 0x38e   :  { %v249_v30 = vsel %vm248_vm0, %v246_v29, 0.0 }
 0x38f   :  { %250 = vadd.xlane.f32.xlu0 %v249_v30 }
 0x395   :  { %v263_v35 = vpop.permute.xlu2 %262 }
 0x402   :  { %v251_v31 = vpop.xlane.xlu0 %250 }
 0x403   :  { %v252_v32 = vmul.f32 -0.5, %v251_v31 }
 0x405   :  { %v254_v33 = vadd.f32 %v252_v32, %v469_v60 }
 0x407   :  { %256 = vrot.lane.b32.xlu1 %v254_v33, %s437_s5 }
 0x479   :  { %v257_v34 = vpop.permute.xlu1 %256 }
 0x47a   :  { %260 = vst.msk [vmem:[#allocation8] sm:$0xff] %vm259_vm1, %v257_v34 }
 0x47b   :  { %266 = vst.msk [vmem:[#allocation8] sm:$0xff] %vm265_vm2, %v263_v35 }
 0x47c   :  { %277 = dma.vmem_to_hbm [thread:$0]  %s273_s7, 128, %s275_s10, [#allocation4]  }
 0x47d   :  { %420 = dma.done.wait [#allocation4], 128  }
 0x47e   :  { %421 = vsyncadd [#allocation4], 4294967168 }
 0x47f   :  { %282 = vsyncpa [#allocation3], 1 }
 0x480   :  { %283 = vsyncpa [#allocation6], 1 }
 0x481   :  { %284 = vsyncpa [#allocation4], 1 }

</bundles_post_ra>
